<compile_context>
chip_gen: v5e
topology: v5e:2x2
jax: 0.10.0
libtpu: 0.0.40
codegen_flags: <defaults>
</compile_context>

<pallas_src>
import functools

import jax
import jax.numpy as jnp
from jax.experimental import pallas as pl
from jax.experimental.pallas import tpu as pltpu


def _dice_partial_kernel(pred_ref, true_ref, inter_ref, union_ref):
    # pred_ref:  (N, C, THW) in producer dtype (f32 or bf16), VMEM tile
    # true_ref:  (N, THW)    int32 labels, -1 marks padded positions
    # inter_ref: (N, C)      f32 accumulator (resident across the HW grid axis)
    # union_ref: (N, C)      f32 accumulator
    k = pl.program_id(0)

    @pl.when(k == 0)
    def _():
        inter_ref[...] = jnp.zeros_like(inter_ref)
        union_ref[...] = jnp.zeros_like(union_ref)

    n, c, thw = pred_ref.shape

    # Upcast after the DMA so HBM traffic stays at the producer's width.
    logits = pred_ref[...].astype(jnp.float32)                 # (N, C, THW)

    # Numerically stable softmax over the channel (sublane) axis.
    m = jnp.max(logits, axis=1, keepdims=True)                 # (N, 1, THW)
    e = jnp.exp(logits - m)                                     # (N, C, THW)
    denom = jnp.sum(e, axis=1, keepdims=True)                   # (N, 1, THW)
    inv = pl.reciprocal(denom)                                  # exact (keeps 1e-5 tol)
    probs = e * inv                                             # (N, C, THW)

    labels = true_ref[...]                                      # (N, THW) int32
    class_ids = jax.lax.broadcasted_iota(jnp.int32, (1, c, 1), 1)
    onehot_mask = labels[:, None, :] == class_ids               # (N, C, THW) bool
    valid = (labels >= 0)[:, None, :]                           # (N, 1, THW) bool

    # Intersection: padded labels (-1) never match a class -> auto-masked.
    inter_ref[...] += jnp.sum(jnp.where(onehot_mask, probs, 0.0), axis=2)
    # Union: mask probs at padded positions; one-hot count is auto-masked.
    union_ref[...] += (
        jnp.sum(jnp.where(valid, probs, 0.0), axis=2)
        + jnp.sum(onehot_mask.astype(jnp.float32), axis=2)
    )


def _round_up(x, m):
    return ((x + m - 1) // m) * m


def dice_loss(y_pred, y_true, smooth=1.0, block_hw=None):
    """y_pred: (N, C, H, W) float32/bfloat16, y_true: (N, H, W) int32/int64 -> scalar f32."""
    assert y_true.dtype in (jnp.int32, jnp.int64), f"y_true.dtype: {y_true.dtype}"
    assert y_true.ndim == 3, f"y_true.shape: {y_true.shape}"
    n, c, h, w = y_pred.shape
    hw = h * w

    pred = y_pred.reshape(n, c, hw)                 # keep producer dtype
    true = y_true.astype(jnp.int32).reshape(n, hw)

    if block_hw is None:
        # Size the spatial tile from a conservative VMEM budget:
        #   2 double-buffered input tiles + ~6 f32 tile-sized temporaries.
        itemsize = pred.dtype.itemsize
        budget = 16 * 1024 * 1024
        bytes_per_lane = 2 * (n * c * itemsize + n * 4) + 6 * n * c * 4
        block_hw = max(128, min(budget // bytes_per_lane, 8192))
        block_hw = (block_hw // 128) * 128
    block_hw = _round_up(min(block_hw, _round_up(hw, 128)), 128)

    hw_pad = _round_up(hw, block_hw)
    if hw_pad != hw:
        pred = jnp.pad(pred, ((0, 0), (0, 0), (0, hw_pad - hw)))
        # -1 never matches a class id -> padded pixels drop out of all sums.
        true = jnp.pad(true, ((0, 0), (0, hw_pad - hw)), constant_values=-1)

    num_blocks = hw_pad // block_hw

    inter, union = pl.pallas_call(
        _dice_partial_kernel,
        out_shape=(
            jax.ShapeDtypeStruct((n, c), jnp.float32),
            jax.ShapeDtypeStruct((n, c), jnp.float32),
        ),
        grid=(num_blocks,),
        in_specs=[
            pl.BlockSpec((n, c, block_hw), lambda k: (0, 0, k)),
            pl.BlockSpec((n, block_hw), lambda k: (0, k)),
        ],
        out_specs=(
            pl.BlockSpec((n, c), lambda k: (0, 0)),
            pl.BlockSpec((n, c), lambda k: (0, 0)),
        ),
        compiler_params=pltpu.CompilerParams(
            dimension_semantics=("arbitrary",),
            vmem_limit_bytes=32 * 1024 * 1024,
        ),
    )(pred, true)

    # O(N*C) epilogue stays in XLA.
    smooth = jnp.float32(smooth)
    dice = (2.0 * inter + smooth) / (union + smooth)
    return 1.0 - jnp.mean(dice)


def _dice_loss_ref(y_pred, y_true, smooth=1.0):
    """Pure-JAX reference mirroring the PyTorch forward."""
    p = jax.nn.softmax(y_pred.astype(jnp.float32), axis=1)
    num_classes = y_pred.shape[1]
    one_hot = jax.nn.one_hot(y_true, num_classes, dtype=jnp.float32)  # (N,H,W,C)
    one_hot = jnp.transpose(one_hot, (0, 3, 1, 2))                    # (N,C,H,W)
    inter = jnp.sum(p * one_hot, axis=(2, 3))
    union = jnp.sum(p, axis=(2, 3)) + jnp.sum(one_hot, axis=(2, 3))
    dice = (2.0 * inter + smooth) / (union + smooth)
    return 1.0 - jnp.mean(dice)


if __name__ == "__main__":
    key = jax.random.PRNGKey(0)
    k_pred, k_true = jax.random.split(key)

    # Test 1: canonical small shape, f32, single tile.
    N, C, H, W = 2, 4, 16, 16
    y_pred = jax.random.normal(k_pred, (N, C, H, W), dtype=jnp.float32)
    y_true = jax.random.randint(k_true, (N, H, W), 0, C, dtype=jnp.int32)

    out = jax.block_until_ready(dice_loss(y_pred, y_true, smooth=1.0))
    ref = _dice_loss_ref(y_pred, y_true, smooth=1.0)
    assert jnp.allclose(out, ref, atol=1e-5, rtol=1e-5), (out, ref)

    # Test 2: non-128-multiple HW (exercises -1 label padding + multi-block
    # accumulation) with a bf16 prediction stream (half the HBM traffic).
    N2, C2, H2, W2 = 2, 4, 20, 20   # HW = 400 -> padded to 512, 4 blocks of 128
    y_pred2 = jax.random.normal(k_pred, (N2, C2, H2, W2), dtype=jnp.float32).astype(
        jnp.bfloat16
    )
    y_true2 = jax.random.randint(k_true, (N2, H2, W2), 0, C2, dtype=jnp.int32)
    out2 = jax.block_until_ready(dice_loss(y_pred2, y_true2, smooth=1.0, block_hw=128))
    ref2 = _dice_loss_ref(y_pred2.astype(jnp.float32), y_true2, smooth=1.0)
    assert jnp.allclose(out2, ref2, atol=2e-3, rtol=2e-3), (out2, ref2)

    print("KERNEL_OK")
</pallas_src>

<mosaic_0001>
module attributes {stable_mosaic.version = 11 : i64} {
  func.func @_dice_partial_kernel(%arg0: i32, %arg1: memref<2x4x256xf32, #tpu.memory_space<vmem>>, %arg2: memref<2x256xi32, #tpu.memory_space<vmem>>, %arg3: memref<2x4xf32, #tpu.memory_space<vmem>>, %arg4: memref<2x4xf32, #tpu.memory_space<vmem>>) attributes {dimension_semantics = [#tpu.dimension_semantics<arbitrary>], iteration_bounds = array<i64: 1>, scalar_prefetch = 0 : i64, scratch_operands = 0 : i64, tpu.core_type = #tpu.core_type<tc>, window_params = [{transform_indices = @transform_0, window_bounds = array<i64: 2, 4, 256>}, {transform_indices = @transform_1, window_bounds = array<i64: 2, 256>}, {pipeline_mode = #tpu.pipeline_mode<synchronous>, transform_indices = @transform_2, window_bounds = array<i64: 2, 4>}, {pipeline_mode = #tpu.pipeline_mode<synchronous>, transform_indices = @transform_3, window_bounds = array<i64: 2, 4>}]} {
    %c0_i32 = arith.constant 0 : i32
    %0 = arith.cmpi eq, %arg0, %c0_i32 : i32
    %1 = arith.extui %0 : i1 to i32
    %c0_i32_0 = arith.constant 0 : i32
    %2 = arith.cmpi ne, %1, %c0_i32_0 : i32
    scf.if %2 {
      %cst_20 = arith.constant 0.000000e+00 : f32
      %41 = vector.broadcast %cst_20 : f32 to vector<2x4xf32>
      %c0_21 = arith.constant 0 : index
      %c0_22 = arith.constant 0 : index
      %42 = vector.load %arg3[%c0_21, %c0_22] : memref<2x4xf32, #tpu.memory_space<vmem>>, vector<2x4xf32>
      tpu.vector_store %arg3[%c0_21, %c0_22], %41 {strides = array<i32>} : memref<2x4xf32, #tpu.memory_space<vmem>>, vector<2x4xf32>,
      %cst_23 = arith.constant 0.000000e+00 : f32
      %43 = vector.broadcast %cst_23 : f32 to vector<2x4xf32>
      %c0_24 = arith.constant 0 : index
      %c0_25 = arith.constant 0 : index
      %44 = vector.load %arg4[%c0_24, %c0_25] : memref<2x4xf32, #tpu.memory_space<vmem>>, vector<2x4xf32>
      tpu.vector_store %arg4[%c0_24, %c0_25], %43 {strides = array<i32>} : memref<2x4xf32, #tpu.memory_space<vmem>>, vector<2x4xf32>,
    } else {
    }
    %c0 = arith.constant 0 : index
    %c0_1 = arith.constant 0 : index
    %c0_2 = arith.constant 0 : index
    %3 = vector.load %arg1[%c0, %c0_1, %c0_2] : memref<2x4x256xf32, #tpu.memory_space<vmem>>, vector<2x4x256xf32>
    %cst = arith.constant dense<0xFF800000> : vector<2x256xf32>
    %4 = vector.multi_reduction <maximumf>, %3, %cst [1] : vector<2x4x256xf32> to vector<2x256xf32>
    %5 = vector.shape_cast %4 : vector<2x256xf32> to vector<2x1x256xf32>
    %6 = vector.broadcast %5 : vector<2x1x256xf32> to vector<2x4x256xf32>
    %7 = arith.subf %3, %6 : vector<2x4x256xf32>
    %8 = math.exp %7 : vector<2x4x256xf32>
    %cst_3 = arith.constant dense<0.000000e+00> : vector<2x256xf32>
    %9 = vector.multi_reduction <add>, %8, %cst_3 [1] : vector<2x4x256xf32> to vector<2x256xf32>
    %10 = vector.shape_cast %9 : vector<2x256xf32> to vector<2x1x256xf32>
    %11 = tpu.reciprocal %10 : vector<2x1x256xf32> -> vector<2x1x256xf32>
    %12 = vector.broadcast %11 : vector<2x1x256xf32> to vector<2x4x256xf32>
    %13 = arith.mulf %8, %12 : vector<2x4x256xf32>
    %c0_4 = arith.constant 0 : index
    %c0_5 = arith.constant 0 : index
    %14 = vector.load %arg2[%c0_4, %c0_5] : memref<2x256xi32, #tpu.memory_space<vmem>>, vector<2x256xi32>
    %15 = tpu.iota {dimensions = array<i32: 1>} : vector<1x4x1xi32>
    %16 = vector.shape_cast %14 : vector<2x256xi32> to vector<2x1x256xi32>
    %17 = vector.broadcast %16 : vector<2x1x256xi32> to vector<2x4x256xi32>
    %18 = vector.broadcast %15 : vector<1x4x1xi32> to vector<2x4x256xi32>
    %19 = arith.cmpi eq, %17, %18 : vector<2x4x256xi32>
    %c0_i32_6 = arith.constant 0 : i32
    %20 = vector.broadcast %c0_i32_6 : i32 to vector<2x256xi32>
    %21 = arith.cmpi sge, %14, %20 : vector<2x256xi32>
    %22 = vector.shape_cast %21 : vector<2x256xi1> to vector<2x1x256xi1>
    %c0_7 = arith.constant 0 : index
    %c0_8 = arith.constant 0 : index
    %23 = vector.load %arg3[%c0_7, %c0_8] : memref<2x4xf32, #tpu.memory_space<vmem>>, vector<2x4xf32>
    %cst_9 = arith.constant 0.000000e+00 : f32
    %24 = vector.broadcast %cst_9 : f32 to vector<2x4x256xf32>
    %25 = arith.select %19, %13, %24 : vector<2x4x256xi1>, vector<2x4x256xf32>
    %cst_10 = arith.constant dense<0.000000e+00> : vector<2x4xf32>
    %26 = vector.multi_reduction <add>, %25, %cst_10 [2] : vector<2x4x256xf32> to vector<2x4xf32>
    %27 = arith.addf %23, %26 : vector<2x4xf32>
    %c0_11 = arith.constant 0 : index
    %c0_12 = arith.constant 0 : index
    %28 = vector.load %arg3[%c0_11, %c0_12] : memref<2x4xf32, #tpu.memory_space<vmem>>, vector<2x4xf32>
    tpu.vector_store %arg3[%c0_11, %c0_12], %27 {strides = array<i32>} : memref<2x4xf32, #tpu.memory_space<vmem>>, vector<2x4xf32>,
    %c0_13 = arith.constant 0 : index
    %c0_14 = arith.constant 0 : index
    %29 = vector.load %arg4[%c0_13, %c0_14] : memref<2x4xf32, #tpu.memory_space<vmem>>, vector<2x4xf32>
    %cst_15 = arith.constant 0.000000e+00 : f32
    %30 = vector.shape_cast %22 : vector<2x1x256xi1> to vector<2x1x256xi1>
    %31 = vector.broadcast %30 : vector<2x1x256xi1> to vector<2x4x256xi1>
    %32 = vector.broadcast %cst_15 : f32 to vector<2x4x256xf32>
    %33 = arith.select %31, %13, %32 : vector<2x4x256xi1>, vector<2x4x256xf32>
    %cst_16 = arith.constant dense<0.000000e+00> : vector<2x4xf32>
    %34 = vector.multi_reduction <add>, %33, %cst_16 [2] : vector<2x4x256xf32> to vector<2x4xf32>
    %35 = arith.extui %19 : vector<2x4x256xi1> to vector<2x4x256xi32>
    %36 = arith.sitofp %35 : vector<2x4x256xi32> to vector<2x4x256xf32>
    %cst_17 = arith.constant dense<0.000000e+00> : vector<2x4xf32>
    %37 = vector.multi_reduction <add>, %36, %cst_17 [2] : vector<2x4x256xf32> to vector<2x4xf32>
    %38 = arith.addf %34, %37 : vector<2x4xf32>
    %39 = arith.addf %29, %38 : vector<2x4xf32>
    %c0_18 = arith.constant 0 : index
    %c0_19 = arith.constant 0 : index
    %40 = vector.load %arg4[%c0_18, %c0_19] : memref<2x4xf32, #tpu.memory_space<vmem>>, vector<2x4xf32>
    tpu.vector_store %arg4[%c0_18, %c0_19], %39 {strides = array<i32>} : memref<2x4xf32, #tpu.memory_space<vmem>>, vector<2x4xf32>,
    return
  }
  func.func @transform_0(%arg0: i32) -> (i32, i32, i32) {
    %c0_i32 = arith.constant 0 : i32
    %c0_i32_0 = arith.constant 0 : i32
    %c0_i32_1 = arith.constant 0 : i32
    return %c0_i32, %c0_i32_0, %arg0 : i32, i32, i32
  }
  func.func @transform_1(%arg0: i32) -> (i32, i32) {
    %c0_i32 = arith.constant 0 : i32
    %c0_i32_0 = arith.constant 0 : i32
    return %c0_i32, %arg0 : i32, i32
  }
  func.func @transform_2(%arg0: i32) -> (i32, i32) {
    %c0_i32 = arith.constant 0 : i32
    %c0_i32_0 = arith.constant 0 : i32
    %c0_i32_1 = arith.constant 0 : i32
    return %c0_i32, %c0_i32_0 : i32, i32
  }
  func.func @transform_3(%arg0: i32) -> (i32, i32) {
    %c0_i32 = arith.constant 0 : i32
    %c0_i32_0 = arith.constant 0 : i32
    %c0_i32_1 = arith.constant 0 : i32
    return %c0_i32, %c0_i32_0 : i32, i32
  }
}

</mosaic_0001>

<bundles_post_ra>
// kernel: tpu_custom_call.1
= control target key start
LH: loop header
LB: loop body
LE: loop exit
PB: predicated region body
PF: predicated region fallthrough
CT: control target
= control target key end

     0   :  { %9 = vsyncpa [#allocation3], 0  ;;  %s751_s0 = inlined_call_operand.hbm [shape: f32[2,4,256], index: 0, kind: input, shape index: {}]   ;;  %s752_s1 = inlined_call_operand.hbm [shape: s32[2,256], index: 1, kind: input, shape index: {}]   ;;  %s753_s2 = inlined_call_operand.hbm [shape: f32[2,4], index: 2, kind: output, shape index: {0}]   ;;  %s754_s3 = inlined_call_operand.hbm [shape: f32[2,4], index: 3, kind: output, shape index: {1}]  }
   0x1   :  { %10 = vsyncpa [#allocation6], 0 }
   0x2   :  { %11 = vsyncpa [#allocation4], 0 }
   0x3   :  { %12 = vsyncpa [#allocation9], 0  ;;  %s17_s14 = sshll.u32 %s751_s0, 4  ;;  %s527_s15 = smov [#allocation2]   ;;  %s18_s14 = int_to_ptr.hbm [resolvable:$true] %s17_s14 }
   0x4   :  { %s19_s16 = sshll.u32 %s527_s15, 4  ;;  %s31_s19 = sshll.u32 %s752_s1, 4  ;;  %s20_s16 = int_to_ptr.vmem [resolvable:$true] %s19_s16  ;;  %s32_s19 = int_to_ptr.hbm [resolvable:$true] %s31_s19 }
   0x5   :  { %s528_s20 = smov 128   ;;  %s529_s21 = smov 8  }
   0x6   :  { %25 = dma.hbm_to_vmem [thread:$0]  %s18_s14, 256, %s20_s16, [#allocation3], %s528_s20, %s528_s20, %s529_s21  }
   0x7   :  { %s530_s22 = smov [#allocation5]  }
   0x8   :  { %s33_s23 = sshll.u32 %s530_s22, 4  ;;  %s34_s23 = int_to_ptr.vmem [resolvable:$true] %s33_s23 }
   0x9   :  { %36 = dma.hbm_to_vmem [thread:$0]  %s32_s19, 64, %s34_s23, [#allocation6]  }
   0xa   :  { %519 = dma.done.wait [#allocation3], 256  }
   0xb   :  { %520 = vsyncadd [#allocation3], 4294967040 }
   0xc   :  { %521 = dma.done.wait [#allocation6], 64  }
   0xd   :  { %522 = vsyncadd [#allocation6], 4294967232  ;;  %v52_v0 = vld [vmem:[#allocation2] sm:$0xff]  ;;  %v53_v1 = vld [vmem:[#allocation2 + $0x8] sm:$0xff]  ;;  %vm67_vm0 = vcmask 1043456   ;;  %vm227_vm1 = vcmask 1040384  }
   0xe   :  { %56 = vst [vmem:[#allocation1] ss:$2 sm:$0xff] %v52_v0  ;;  %v575_v51 = vld [vmem:[#allocation5] sm:$0xf]  ;;  %vm229_vm2 = vcmask 1042434   ;;  %vm231_vm3 = vcmask 1041408  }
   0xf   :  { %60 = vst [vmem:[#allocation1 + $0x10] ss:$2 sm:$0xff] %v53_v1  ;;  %v224_v54 = vrot.slane %v575_v51, 1  ;;  %v225_v55 = vrot.slane %v575_v51, 2  ;;  %v226_v57 = vrot.slane %v575_v51, 3  ;;  %vm248_vm4 = vcmp.ge.s32.totalorder %v575_v51, 0 }
  0x10   :  { %vm233_vm9 = vcmask 1041409   ;;  %vm235_vm14 = vcmask 1043459   ;;  %vm237_vm15 = vcmask 1042433   ;;  %s533_s0 = smov [#allocation7]   ;;  %s372_s26 = sshll.u32 %s753_s2, 4  ;;  %s373_s26 = int_to_ptr.hbm [resolvable:$true] %s372_s26 }
  0x11   :  { %v228_v63 = vsel %vm227_vm1, %v575_v51, %v224_v54  ;;  %s370_s1 = sshll.u32 %s533_s0, 4  ;;  %s534_s27 = smov [#allocation8]   ;;  %s371_s1 = int_to_ptr.vmem [resolvable:$true] %s370_s1 }
  0x12   :  { %s381_s28 = sshll.u32 %s534_s27, 4  ;;  %s383_s2 = sshll.u32 %s754_s3, 4  ;;  %s382_s28 = int_to_ptr.vmem [resolvable:$true] %s381_s28  ;;  %s384_s2 = int_to_ptr.hbm [resolvable:$true] %s383_s2 }
  0x15   :  { %v57_v2 = vld.sshfl [vmem:[#allocation1] sm:$0xff pattern:$0x75316420]  ;;  %v58_v3 = vld.sshfl [vmem:[#allocation1 + $0x8] sm:$0xff pattern:$0x75316420] }
  0x16   :  { %v68_v4 = vsel %vm67_vm0, %v57_v2, -inf  ;;  %v75_v5 = vsel %vm67_vm0, %v58_v3, -inf  ;;  %v61_v6 = vld.sshfl [vmem:[#allocation1 + $0x10] sm:$0xff pattern:$0x75316420] }
  0x17   :  { %v69_v7 = vrot.slane %v68_v4, 4  ;;  %v76_v8 = vrot.slane %v75_v5, 4  ;;  %v62_v9 = vld.sshfl [vmem:[#allocation1 + $0x18] sm:$0xff pattern:$0x75316420]  ;;  %v82_v10 = vsel %vm67_vm0, %v61_v6, -inf }
  0x18   :  { %v83_v11 = vrot.slane %v82_v10, 4  ;;  %v89_v12 = vsel %vm67_vm0, %v62_v9, -inf }
  0x19   :  { %v70_v13 = vmax.f32 %v68_v4, %v69_v7  ;;  %v77_v14 = vmax.f32 %v75_v5, %v76_v8  ;;  %v90_v15 = vrot.slane %v89_v12, 4  ;;  %v222_v4 = vlaneseq }
  0x1a   :  { %v84_v16 = vmax.f32 %v82_v10, %v83_v11 }
  0x1b   :  { %v71_v17 = vrot.slane %v70_v13, 2  ;;  %v78_v18 = vrot.slane %v77_v14, 2  ;;  %v91_v19 = vmax.f32 %v89_v12, %v90_v15 }
  0x1c   :  { %v85_v20 = vrot.slane %v84_v16, 2 }
  0x1d   :  { %v72_v21 = vmax.f32 %v70_v13, %v71_v17  ;;  %v79_v22 = vmax.f32 %v77_v14, %v78_v18  ;;  %v92_v23 = vrot.slane %v91_v19, 2  ;;  %v593_v13 = vshrl.u32 %v222_v4, 7 }
  0x1e   :  { %v86_v24 = vmax.f32 %v84_v16, %v85_v20  ;;  %v531_v18 = vmov 0  }
  0x1f   :  { %v73_v25 = vrot.slane %v72_v21, 1  ;;  %v80_v26 = vrot.slane %v79_v22, 1  ;;  %v93_v27 = vmax.f32 %v91_v19, %v92_v23  ;;  %v597_v19 = vsel %vm248_vm4, 1, %v531_v18 }
  0x20   :  { %v87_v28 = vrot.slane %v86_v24, 1 }
  0x21   :  { %v74_v29 = vmax.f32 %v72_v21, %v73_v25  ;;  %v81_v30 = vmax.f32 %v79_v22, %v80_v26  ;;  %v94_v31 = vrot.slane %v93_v27, 1  ;;  %v532_v22 = vmov 0.0  }
  0x22   :  { %v88_v33 = vmax.f32 %v86_v24, %v87_v28  ;;  %v250_v28 = vrot.slane %v597_v19, 1 }
  0x23   :  { %v100_v32 = vrot.slane %v81_v30, 4  ;;  %v95_v34 = vmax.f32 %v93_v27, %v94_v31 }
  0x25   :  { %v102_v35 = vsel %vm67_vm0, %v74_v29, %v100_v32  ;;  %v101_v36 = vrot.slane %v95_v34, 4  ;;  %v251_v32 = vrot.slane %v597_v19, 2 }
  0x26   :  { %v106_v37 = vsub.f32 %v52_v0, %v102_v35  ;;  %v230_v0 = vsel %vm229_vm2, %v225_v55, %v226_v57 }
  0x27   :  { %v103_v38 = vsel %vm67_vm0, %v88_v33, %v101_v36  ;;  %v232_v8 = vsel %vm231_vm3, %v228_v63, %v230_v0  ;;  %v252_v33 = vrot.slane %v597_v19, 3  ;;  %v236_v63 = vsel %vm235_vm14, %v225_v55, %v226_v57 }
  0x28   :  { %v108_v39 = vmul.f32 1.442695, %v106_v37  ;;  %v107_v40 = vsub.f32 %v53_v1, %v103_v38  ;;  %v240_v14 = vperm.slane %v232_v8, 0  ;;  %v241_v15 = vperm.slane %v232_v8, 1 }
  0x2a   :  { %411 = vpow2.f32 %v108_v39  ;;  %v110_v41 = vmul.f32 1.442695, %v107_v40  ;;  %vm600_vm5 = vcmp.eq.s32.totalorder %v240_v14, %v593_v13  ;;  %vm605_vm6 = vcmp.eq.s32.totalorder %v241_v15, %v593_v13 }
  0x2b   :  { %v399_v23 = vsel %vm600_vm5, 1.0, %v532_v22  ;;  %v400_v24 = vsel %vm605_vm6, 1.0, %v532_v22 }
  0x2c   :  { %413 = vpow2.f32 %v110_v41  ;;  %v345_v26 = vsel %vm67_vm0, %v399_v23, 0.0  ;;  %v346_v27 = vsel %vm67_vm0, %v400_v24, 0.0 }
  0x2d   :  { %v347_v31 = vadd.f32 %v346_v27, %v345_v26 }
  0x2f   :  { %348 = vadd.xlane.f32.xlu1 %v347_v31 }
  0x30   :  { %v567_v42 = vpop.eup %411 }
  0x31   :  { %114 = vst [vmem:[#allocation1] ss:$2 sm:$0xff] %v567_v42 }
  0x32   :  { %v570_v43 = vpop.eup %413 }
  0x33   :  { %118 = vst [vmem:[#allocation1 + $0x10] ss:$2 sm:$0xff] %v570_v43 }
  0x38   :  { %v115_v44 = vld.sshfl [vmem:[#allocation1] sm:$0xff pattern:$0x75316420]  ;;  %v116_v45 = vld.sshfl [vmem:[#allocation1 + $0x8] sm:$0xff pattern:$0x75316420] }
  0x39   :  { %v125_v46 = vsel %vm67_vm0, %v115_v44, 0.0  ;;  %v132_v47 = vsel %vm67_vm0, %v116_v45, 0.0 }
  0x3a   :  { %v126_v48 = vrot.slane %v125_v46, 4  ;;  %v133_v49 = vrot.slane %v132_v47, 4  ;;  %v119_v50 = vld.sshfl [vmem:[#allocation1 + $0x10] sm:$0xff pattern:$0x75316420] }
  0x3b   :  { %v120_v56 = vld.sshfl [vmem:[#allocation1 + $0x18] sm:$0xff pattern:$0x75316420]  ;;  %v139_v58 = vsel %vm67_vm0, %v119_v50, 0.0 }
  0x3c   :  { %v127_v52 = vadd.f32 %v126_v48, %v125_v46  ;;  %v134_v53 = vadd.f32 %v133_v49, %v132_v47  ;;  %v146_v59 = vsel %vm67_vm0, %v120_v56, 0.0  ;;  %v140_v62 = vrot.slane %v139_v58, 4 }
  0x3d   :  { %v147_v1 = vrot.slane %v146_v59, 4  ;;  %v254_v56 = vsel %vm229_vm2, %v251_v32, %v252_v33 }
  0x3e   :  { %v128_v60 = vrot.slane %v127_v52, 2  ;;  %v135_v61 = vrot.slane %v134_v53, 2  ;;  %v141_v5 = vadd.f32 %v140_v62, %v139_v58  ;;  %v234_v58 = vsel %vm233_vm9, %v575_v51, %v224_v54 }
  0x3f   :  { %v148_v10 = vadd.f32 %v147_v1, %v146_v59 }
  0x40   :  { %v129_v2 = vadd.f32 %v128_v60, %v127_v52  ;;  %v136_v3 = vadd.f32 %v135_v61, %v134_v53  ;;  %v142_v9 = vrot.slane %v141_v5, 2  ;;  %v253_v53 = vsel %vm227_vm1, %v597_v19, %v250_v28 }
  0x41   :  { %v149_v17 = vrot.slane %v148_v10, 2  ;;  %v255_v1 = vsel %vm231_vm3, %v253_v53, %v254_v56 }
  0x42   :  { %v130_v6 = vrot.slane %v129_v2, 1  ;;  %v137_v7 = vrot.slane %v136_v3, 1  ;;  %v143_v16 = vadd.f32 %v142_v9, %v141_v5 }
  0x43   :  { %v150_v29 = vadd.f32 %v149_v17, %v148_v10 }
  0x44   :  { %v131_v11 = vadd.f32 %v130_v6, %v129_v2  ;;  %v138_v12 = vadd.f32 %v137_v7, %v136_v3  ;;  %v144_v25 = vrot.slane %v143_v16, 1  ;;  %v238_v2 = vsel %vm237_vm15, %v234_v58, %v236_v63 }
  0x45   :  { %v151_v38 = vrot.slane %v150_v29, 1  ;;  %v239_v8 = vrot.slane %v238_v2, 1 }
  0x46   :  { %415 = vrcp.f32 %v131_v11  ;;  %v620_v34 = vadd.f32 %v144_v25, %v143_v16  ;;  %vm158_vm7 = vweird.f32 %v131_v11  ;;  %v164_v37 = vand.u32 2147483648, %v131_v11 }
  0x47   :  { %417 = vrcp.f32 %v138_v12  ;;  %v162_v39 = vand.u32 2147483647, %v131_v11  ;;  %v178_v41 = vand.u32 2147483648, %v138_v12  ;;  %v622_v45 = vadd.f32 %v151_v38, %v150_v29 }
  0x48   :  { %419 = vrcp.f32 %v620_v34  ;;  %vm172_vm10 = vweird.f32 %v138_v12  ;;  %v176_v47 = vand.u32 2147483647, %v138_v12  ;;  %v165_v49 = vor.u32 1.1754944e-38, %v164_v37 }
  0x49   :  { %421 = vrcp.f32 %v622_v45  ;;  %v179_v61 = vor.u32 1.1754944e-38, %v178_v41  ;;  %vm163_vm1 = vcmp.eq.f32.partialorder %v162_v39, 8.507059e+37  ;;  %vm186_vm2 = vweird.f32 %v620_v34 }
  0x4a   :  { %vm177_vm4 = vcmp.eq.f32.partialorder %v176_v47, 8.507059e+37  ;;  %v190_v6 = vand.u32 2147483647, %v620_v34  ;;  %v192_v51 = vand.u32 2147483648, %v620_v34  ;;  %v206_v14 = vand.u32 2147483648, %v622_v45 }
  0x4b   :  { %v668_v15 = vperm.slane %v239_v8, 0  ;;  %v670_v16 = vperm.slane %v239_v8, 1  ;;  %v257_v47 = vsel %vm235_vm14, %v251_v32, %v252_v33 }
  0x4c   :  { %v416_v30 = vpop.eup %415 }
  0x4d   :  { %v418_v35 = vpop.eup %417  ;;  %v154_v36 = vmul.f32 %v416_v30, %v131_v11  ;;  %vm159_vm8 = vweird.f32 %v416_v30 }
  0x4e   :  { %v168_v40 = vmul.f32 %v418_v35, %v138_v12  ;;  %vm173_vm11 = vweird.f32 %v418_v35  ;;  %vm628_vm12 = vmor %vm158_vm7, %vm159_vm8  ;;  %v420_v0 = vpop.eup %419  ;;  %vm200_vm7 = vweird.f32 %v622_v45  ;;  %v204_v12 = vand.u32 2147483647, %v622_v45 }
  0x4f   :  { %v155_v44 = vsub.f32 1.0, %v154_v36  ;;  %vm645_vm13 = vmor %vm172_vm10, %vm173_vm11  ;;  %v182_v5 = vmul.f32 %v420_v0, %v620_v34  ;;  %v422_v55 = vpop.eup %421  ;;  %vm187_vm3 = vweird.f32 %v420_v0  ;;  %vm680_vm11 = vcmp.eq.f32.partialorder %v190_v6, 8.507059e+37 }
  0x50   :  { %v169_v46 = vsub.f32 1.0, %v168_v40  ;;  %v196_v11 = vmul.f32 %v422_v55, %v622_v45  ;;  %vm201_vm8 = vweird.f32 %v422_v55  ;;  %vm676_vm10 = vmor %vm186_vm2, %vm187_vm3  ;;  %v193_v34 = vor.u32 1.1754944e-38, %v192_v51 }
  0x51   :  { %v156_v48 = vmul.f32 %v416_v30, %v155_v44  ;;  %v183_v10 = vsub.f32 1.0, %v182_v5  ;;  %vm260_vm2 = vcmp.ne.s32.totalorder %v255_v1, 0  ;;  %v256_v45 = vsel %vm233_vm9, %v597_v19, %v250_v28 }
  0x52   :  { %v170_v52 = vmul.f32 %v418_v35, %v169_v46  ;;  %v197_v24 = vsub.f32 1.0, %v196_v11  ;;  %v258_v56 = vsel %vm237_vm15, %v256_v45, %v257_v47  ;;  %vm49_vm3 = vcmask 25600  }
  0x53   :  { %v157_v59 = vadd.f32 %v416_v30, %v156_v48  ;;  %v184_v23 = vmul.f32 %v420_v0, %v183_v10  ;;  %50 = vst.msk [vmem:[#allocation7] sm:$0x3] %vm49_vm3, %v532_v22 }
  0x54   :  { %v171_v62 = vadd.f32 %v418_v35, %v170_v52  ;;  %51 = vst.msk [vmem:[#allocation8] sm:$0x3] %vm49_vm3, %v532_v22 }
  0x55   :  { %v161_v54 = vsel %vm628_vm12, %v416_v30, %v157_v59  ;;  %vm246_vm12 = vcmp.eq.s32.totalorder %v668_v15, %v593_v13  ;;  %v185_v29 = vadd.f32 %v420_v0, %v184_v23  ;;  %v198_v30 = vmul.f32 %v422_v55, %v197_v24 }
  0x56   :  { %v175_v3 = vsel %vm645_vm13, %v418_v35, %v171_v62  ;;  %v166_v57 = vsel %vm163_vm1, %v165_v49, %v161_v54  ;;  %vm247_vm13 = vcmp.eq.s32.totalorder %v670_v16, %v593_v13  ;;  %vm202_vm1 = vmor %vm200_vm7, %vm201_vm8  ;;  %v207_v35 = vor.u32 1.1754944e-38, %v206_v14 }
  0x57   :  { %v180_v7 = vsel %vm177_vm4, %v179_v61, %v175_v3  ;;  %v402_v31 = vsel %vm247_vm13, 1.0, %v532_v22  ;;  %v189_v38 = vsel %vm676_vm10, %v420_v0, %v185_v29  ;;  %v199_v39 = vadd.f32 %v422_v55, %v198_v30 }
  0x58   :  { %v213_v9 = vrot.slane %v180_v7, 4  ;;  %v351_v37 = vsel %vm67_vm0, %v402_v31, 0.0  ;;  %vm205_vm4 = vcmp.eq.f32.partialorder %v204_v12, 8.507059e+37  ;;  %v194_v44 = vsel %vm680_vm11, %v193_v34, %v189_v38 }
  0x59   :  { %v203_v41 = vsel %vm202_vm1, %v422_v55, %v199_v39  ;;  %v302_v49 = vsel %vm260_vm2, 1, %v531_v18  ;;  %v259_v62 = vrot.slane %v258_v56, 1 }
  0x5a   :  { %v215_v17 = vsel %vm67_vm0, %v166_v57, %v213_v9  ;;  %v208_v46 = vsel %vm205_vm4, %v207_v35, %v203_v41  ;;  %v304_v59 = vperm.slane %v302_v49, 0  ;;  %v305_v60 = vperm.slane %v302_v49, 1  ;;  %v262_v27 = vld [vmem:[#allocation7] sm:$0x3] }
  0x5b   :  { %v219_v25 = vmul.f32 %v567_v42, %v215_v17  ;;  %v401_v42 = vsel %vm246_vm12, 1.0, %v532_v22  ;;  %v214_v48 = vrot.slane %v208_v46, 4  ;;  %vm261_vm7 = vcmp.ne.s32.totalorder %v259_v62, 0 }
  0x5c   :  { %v350_v36 = vsel %vm67_vm0, %v401_v42, 0.0  ;;  %vm308_vm14 = vcmp.eq.s32.totalorder %v304_v59, 1  ;;  %vm309_vm15 = vcmp.eq.s32.totalorder %v305_v60, 1  ;;  %v303_v2 = vsel %vm261_vm7, 1, %v531_v18 }
  0x5d   :  { %265 = vst [vmem:[#allocation1] ss:$2 sm:$0xff] %v219_v25  ;;  %v352_v40 = vadd.f32 %v351_v37, %v350_v36  ;;  %v216_v53 = vsel %vm67_vm0, %v194_v44, %v214_v48  ;;  %v306_v7 = vperm.slane %v303_v2, 0  ;;  %v307_v8 = vperm.slane %v303_v2, 1  ;;  %v301_v36 = vld [vmem:[#allocation8] sm:$0x3] }
  0x5e   :  { %v220_v19 = vmul.f32 %v570_v43, %v216_v53  ;;  %v293_v17 = vand.u32 127, %v222_v4 }
  0x5f   :  { %353 = vadd.xlane.f32.xlu1 %v352_v40 }
  0x60   :  { %269 = vst [vmem:[#allocation1 + $0x10] ss:$2 sm:$0xff] %v220_v19 }
  0x64   :  { %v266_v50 = vld.sshfl [vmem:[#allocation1] sm:$0xff pattern:$0x75316420]  ;;  %v267_v52 = vld.sshfl [vmem:[#allocation1 + $0x8] sm:$0xff pattern:$0x75316420] }
  0x65   :  { %v276_v58 = vsel %vm600_vm5, %v266_v50, 0.0  ;;  %v277_v28 = vsel %vm605_vm6, %v267_v52, 0.0  ;;  %312 = vst [vmem:[#allocation1] ss:$2 sm:$0xff] %v219_v25  ;;  %vm310_vm5 = vcmp.eq.s32.totalorder %v306_v7, 1  ;;  %vm311_vm6 = vcmp.eq.s32.totalorder %v307_v8, 1 }
  0x66   :  { %v280_v32 = vsel %vm67_vm0, %v276_v58, 0.0  ;;  %v281_v33 = vsel %vm67_vm0, %v277_v28, 0.0 }
  0x67   :  { %v282_v61 = vadd.f32 %v281_v33, %v280_v32  ;;  %v270_v1 = vld.sshfl [vmem:[#allocation1 + $0x10] sm:$0xff pattern:$0x75316420]  ;;  %v271_v5 = vld.sshfl [vmem:[#allocation1 + $0x18] sm:$0xff pattern:$0x75316420] }
  0x68   :  { %v278_v6 = vsel %vm246_vm12, %v270_v1, 0.0  ;;  %v279_v51 = vsel %vm247_vm13, %v271_v5, 0.0  ;;  %316 = vst [vmem:[#allocation1 + $0x10] ss:$2 sm:$0xff] %v220_v19 }
  0x69   :  { %283 = vadd.xlane.f32.xlu2 %v282_v61  ;;  %v285_v55 = vsel %vm67_vm0, %v278_v6, 0.0  ;;  %v286_v57 = vsel %vm67_vm0, %v279_v51, 0.0 }
  0x6a   :  { %v287_v9 = vadd.f32 %v286_v57, %v285_v55 }
  0x6c   :  { %v313_v20 = vld.sshfl [vmem:[#allocation1] sm:$0xff pattern:$0x75316420]  ;;  %v314_v63 = vld.sshfl [vmem:[#allocation1 + $0x8] sm:$0xff pattern:$0x75316420] }
  0x6d   :  { %v323_v21 = vsel %vm308_vm14, %v313_v20, 0.0  ;;  %v324_v0 = vsel %vm309_vm15, %v314_v63, 0.0 }
  0x6e   :  { %v327_v54 = vsel %vm67_vm0, %v323_v21, 0.0  ;;  %v328_v43 = vsel %vm67_vm0, %v324_v0, 0.0 }
  0x6f   :  { %v329_v3 = vadd.f32 %v328_v43, %v327_v54  ;;  %v317_v18 = vld.sshfl [vmem:[#allocation1 + $0x10] sm:$0xff pattern:$0x75316420]  ;;  %v318_v10 = vld.sshfl [vmem:[#allocation1 + $0x18] sm:$0xff pattern:$0x75316420] }
  0x70   :  { %v325_v11 = vsel %vm310_vm5, %v317_v18, 0.0  ;;  %v326_v12 = vsel %vm311_vm6, %v318_v10, 0.0 }
  0x71   :  { %330 = vadd.xlane.f32.xlu0 %v329_v3  ;;  %288 = vadd.xlane.f32.xlu2 %v287_v9  ;;  %v332_v14 = vsel %vm67_vm0, %v325_v11, 0.0  ;;  %v333_v13 = vsel %vm67_vm0, %v326_v12, 0.0 }
  0x72   :  { %v334_v15 = vadd.f32 %v333_v13, %v332_v14 }
  0x79   :  { %335 = vadd.xlane.f32.xlu0 %v334_v15 }
  0xa2   :  { %v349_v23 = vpop.xlane.xlu1 %348 }
  0xd2   :  { %v354_v4 = vpop.xlane.xlu1 %353 }
  0xdc   :  { %v284_v16 = vpop.xlane.xlu2 %283 }
  0xdd   :  { %v294_v25 = vperm.slane %v284_v16, %v293_v17 }
  0xe4   :  { %v331_v24 = vpop.xlane.xlu0 %330  ;;  %v289_v26 = vpop.xlane.xlu2 %288 }
  0xe5   :  { %v295_v29 = vperm.slane %v289_v26, %v293_v17  ;;  %v355_v22 = vadd.f32 %v349_v23, %v331_v24 }
  0xe7   :  { %v296_v30 = vsel %vm233_vm9, %v295_v29, %v294_v25  ;;  %v359_v35 = vperm.slane %v355_v22, %v293_v17 }
  0xe8   :  { %v298_v42 = vadd.f32 %v296_v30, %v262_v27 }
  0xea   :  { %300 = vst.msk [vmem:[#allocation7] sm:$0x3] %vm49_vm3, %v298_v42 }
  0xeb   :  { %375 = dma.vmem_to_hbm [thread:$0]  %s371_s1, 32, %s373_s26, [#allocation4]  }
  0xec   :  { %v336_v31 = vpop.xlane.xlu0 %335 }
  0xed   :  { %v356_v34 = vadd.f32 %v354_v4, %v336_v31 }
  0xef   :  { %v360_v37 = vperm.slane %v356_v34, %v293_v17 }
  0xf1   :  { %v361_v38 = vsel %vm233_vm9, %v360_v37, %v359_v35 }
  0xf2   :  { %v363_v39 = vadd.f32 %v361_v38, %v301_v36 }
  0xf4   :  { %364 = vst.msk [vmem:[#allocation8] sm:$0x3] %vm49_vm3, %v363_v39 }
  0xf5   :  { %386 = dma.vmem_to_hbm [thread:$0]  %s382_s28, 32, %s384_s2, [#allocation9]  }
  0xf6   :  { %523 = dma.done.wait [#allocation4], 32  }
  0xf7   :  { %524 = vsyncadd [#allocation4], 4294967264 }
  0xf8   :  { %525 = dma.done.wait [#allocation9], 32  }
  0xf9   :  { %526 = vsyncadd [#allocation9], 4294967264 }
  0xfa   :  { %395 = vsyncpa [#allocation3], 1 }
  0xfb   :  { %396 = vsyncpa [#allocation6], 1 }
  0xfc   :  { %397 = vsyncpa [#allocation4], 1 }
  0xfd   :  { %398 = vsyncpa [#allocation9], 1 }

</bundles_post_ra>
